<compile_context>
chip_gen: v7x
topology: tpu7x:2x2x1
jax: 0.10.0
libtpu: 0.0.40
codegen_flags: <defaults>
</compile_context>

<pallas_src>
import jax
import jax.numpy as jnp
from jax import lax
from jax.experimental import pallas as pl
from jax.experimental.pallas import tpu as pltpu


def _round_up(x: int, m: int) -> int:
    return (x + m - 1) // m * m


# ----------------------------------------------------------------------------
# Parameter setup (plain JAX glue): the deterministic sinusoidal table.
# Mirrors the PyTorch __init__ exactly.
# ----------------------------------------------------------------------------
def make_sinusoidal_table(d_model: int, max_len: int = 128, denom: float = 10000.0):
    assert d_model % 2 == 0, "d_model must be even (same assumption as the PyTorch module)"
    pos = jnp.arange(0.0, max_len, dtype=jnp.float32)[:, None]                   # (max_len, 1)
    div = jnp.exp(-jnp.arange(0.0, d_model, 2.0, dtype=jnp.float32)
                  / d_model * jnp.log(jnp.float32(denom)))                        # (d_model//2,)
    angles = pos * div                                                            # (max_len, d_model//2)
    table = jnp.zeros((max_len, d_model), dtype=jnp.float32)
    table = table.at[:, 0::2].set(jnp.sin(angles))
    table = table.at[:, 1::2].set(jnp.cos(angles))
    return table


def _split_bf16_3(x_f32: jax.Array) -> jax.Array:
    """Exact 3-piece bf16 decomposition of an f32 array: p0 + p1 + p2 ~= x (<=1 ulp)."""
    p0 = x_f32.astype(jnp.bfloat16)
    r1 = x_f32 - p0.astype(jnp.float32)
    p1 = r1.astype(jnp.bfloat16)
    r2 = r1 - p1.astype(jnp.float32)
    p2 = r2.astype(jnp.bfloat16)
    return jnp.stack([p0, p1, p2], axis=0)            # (3, ...) bf16


# ----------------------------------------------------------------------------
# Kernel A (D % 128 == 0): row-major one-hot gather.
#   ids_ref : (tm, 1)   int32
#   tbl_ref : (3, L, D) bf16   (exact hi/mid/lo pieces of the f32 table)
#   out_ref : (tm, D)   f32    (lane-dense: D is a multiple of 128)
# ----------------------------------------------------------------------------
def _gather_rows_kernel(ids_ref, tbl_ref, out_ref):
    tm = out_ref.shape[0]
    L = tbl_ref.shape[1]
    ids = ids_ref[...]                                           # (tm, 1)
    cols = lax.broadcasted_iota(jnp.int32, (tm, L), 1)           # (tm, L)
    onehot = (cols == ids).astype(jnp.bfloat16)                  # exact 0/1 in bf16
    acc = jnp.dot(onehot, tbl_ref[0], preferred_element_type=jnp.float32)
    acc = acc + jnp.dot(onehot, tbl_ref[1], preferred_element_type=jnp.float32)
    acc = acc + jnp.dot(onehot, tbl_ref[2], preferred_element_type=jnp.float32)
    out_ref[...] = acc


# ----------------------------------------------------------------------------
# Kernel B (D % 128 != 0, e.g. D=32): transposed product, lane-dense output.
#   ids_ref   : (1, 1, tm) int32  (lane-dense ids)
#   tbl_t_ref : (3, D, L)  bf16   (pre-transposed table pieces)
#   out_t_ref : (D, tm)    f32    (lane-dense: tm is a multiple of 128)
# ----------------------------------------------------------------------------
def _gather_cols_kernel(ids_ref, tbl_t_ref, out_t_ref):
    tm = out_t_ref.shape[1]
    L = tbl_t_ref.shape[2]
    ids = ids_ref[0]                                             # (1, tm)
    rows = lax.broadcasted_iota(jnp.int32, (L, tm), 0)           # (L, tm)
    onehot_t = (rows == ids).astype(jnp.bfloat16)                # exact 0/1 in bf16
    acc = jnp.dot(tbl_t_ref[0], onehot_t, preferred_element_type=jnp.float32)
    acc = acc + jnp.dot(tbl_t_ref[1], onehot_t, preferred_element_type=jnp.float32)
    acc = acc + jnp.dot(tbl_t_ref[2], onehot_t, preferred_element_type=jnp.float32)
    out_t_ref[...] = acc


# ----------------------------------------------------------------------------
# Wrapper: flatten (B, S), pick a balanced lane-aligned token tile, run the tiled
# kernel, slice/reshape back to (B, S, D).
# ----------------------------------------------------------------------------
_VMEM_LIMIT = 32 * 1024 * 1024       # safe on v5e (128 MiB phys) / v6e / v7x (64 MiB)
_VMEM_BUDGET = 20 * 1024 * 1024      # headroom inside the 32 MiB scoped limit


def _pick_token_tile(n_tokens: int, d_model: int, max_len: int,
                     max_tokens_per_tile: int = 2048):
    table_bytes = 2 * 3 * max_len * d_model * 2          # double-buffered bf16 pieces
    per_tok = 8 * d_model + 2048                          # out f32 x2 + onehot + ids (padded)
    avail = max(_VMEM_BUDGET - table_bytes, per_tok * 128)
    tm_cap = max(128, min(max_tokens_per_tile, (avail // per_tok) // 128 * 128))
    num_tiles = pl.cdiv(n_tokens, tm_cap)
    if num_tiles > 1 and num_tiles % 2:                   # v7x megacore: even tile count
        num_tiles += 1
    tm = _round_up(pl.cdiv(n_tokens, num_tiles), 128)     # balanced -> padding < one tile
    return tm, num_tiles


def sinusoidal_positional_embedding(x: jax.Array, table: jax.Array) -> jax.Array:
    B, S = x.shape
    L, D = table.shape
    N = B * S

    # Clamp defends against out-of-range ids (PyTorch nn.Embedding would raise;
    # here they map to the last row).  Padded rows gather row 0 and are sliced off.
    ids = jnp.clip(x.reshape(-1).astype(jnp.int32), 0, L - 1)

    pieces = _split_bf16_3(table)                         # (3, L, D) bf16, exact

    tm, num_tiles = _pick_token_tile(N, D, L)
    n_pad = tm * num_tiles
    ids_flat = jnp.pad(ids, (0, n_pad - N))

    compiler_params = pltpu.CompilerParams(
        dimension_semantics=("parallel",),                # v7x: shard token tiles over 2 TCs
        vmem_limit_bytes=_VMEM_LIMIT,
    )

    if D % 128 == 0:
        # Row-major gather: output (tm, D) is already lane-dense.
        ids_in = ids_flat.reshape(n_pad, 1)
        out = pl.pallas_call(
            _gather_rows_kernel,
            out_shape=jax.ShapeDtypeStruct((n_pad, D), jnp.float32),
            grid_spec=pltpu.PrefetchScalarGridSpec(
                num_scalar_prefetch=0,
                grid=(num_tiles,),
                in_specs=[
                    pl.BlockSpec((tm, 1), lambda i: (i, 0)),         # ids tile
                    pl.BlockSpec((3, L, D), lambda i: (0, 0, 0)),    # table pieces, resident
                ],
                out_specs=pl.BlockSpec((tm, D), lambda i: (i, 0)),
            ),
            compiler_params=compiler_params,
        )(ids_in, pieces)
        return out[:N].reshape(B, S, D)

    # Lane-dense (transposed) path for D < 128 or D not a multiple of 128.
    ids_in = ids_flat.reshape(num_tiles, 1, tm)
    pieces_t = jnp.transpose(pieces, (0, 2, 1))           # (3, D, L) bf16
    out_t = pl.pallas_call(
        _gather_cols_kernel,
        out_shape=jax.ShapeDtypeStruct((D, n_pad), jnp.float32),
        grid_spec=pltpu.PrefetchScalarGridSpec(
            num_scalar_prefetch=0,
            grid=(num_tiles,),
            in_specs=[
                pl.BlockSpec((1, 1, tm), lambda i: (i, 0, 0)),       # lane-dense ids tile
                pl.BlockSpec((3, D, L), lambda i: (0, 0, 0)),        # table pieces, resident
            ],
            out_specs=pl.BlockSpec((D, tm), lambda i: (0, i)),       # lane-dense output
        ),
        compiler_params=compiler_params,
    )(ids_in, pieces_t)
    # Layout plumbing back to (B, S, D); the kernel store/writeback stays lane-dense.
    return out_t[:, :N].T.reshape(B, S, D)


if __name__ == "__main__":
    max_len = 128
    B, S = 2, 8

    key = jax.random.PRNGKey(0)
    x = jax.random.randint(key, (B, S), 0, max_len, dtype=jnp.int32)

    # Exercise both paths: D=32 (lane-dense transposed) and D=128 (row-major).
    for d_model in (32, 128):
        table = make_sinusoidal_table(d_model, max_len=max_len, denom=10000.0)
        out = jax.block_until_ready(sinusoidal_positional_embedding(x, table))

        # Reference: plain JAX gather (identical to PyTorch nn.Embedding forward).
        ref = jnp.take(table, x.reshape(-1), axis=0).reshape(B, S, d_model)

        assert out.shape == (B, S, d_model), out.shape
        assert out.dtype == jnp.float32, out.dtype
        assert jnp.allclose(out, ref, rtol=1e-6, atol=1e-6), f"mismatch at d_model={d_model}"

    print("KERNEL_OK")
</pallas_src>

<mosaic_0001>
module attributes {stable_mosaic.version = 11 : i64} {
  func.func @_gather_cols_kernel(%arg0: i32, %arg1: memref<1x1x128xi32, #tpu.memory_space<vmem>>, %arg2: memref<3x32x128xbf16, #tpu.memory_space<vmem>>, %arg3: memref<32x128xf32, #tpu.memory_space<vmem>>) attributes {dimension_semantics = [#tpu.dimension_semantics<parallel>], iteration_bounds = array<i64: 1>, scalar_prefetch = 0 : i64, scratch_operands = 0 : i64, tpu.core_type = #tpu.core_type<tc>, window_params = [{transform_indices = @transform_0, window_bounds = array<i64: 1, 1, 128>}, {pipeline_mode = #tpu.pipeline_mode<synchronous>, transform_indices = @transform_1, window_bounds = array<i64: 3, 32, 128>}, {transform_indices = @transform_2, window_bounds = array<i64: 32, 128>}]} {
    %c0 = arith.constant 0 : index
    %c0_0 = arith.constant 0 : index
    %c0_1 = arith.constant 0 : index
    %0 = vector.load %arg1[%c0, %c0_0, %c0_1] : memref<1x1x128xi32, #tpu.memory_space<vmem>>, vector<1x1x128xi32>
    %1 = vector.shape_cast %0 : vector<1x1x128xi32> to vector<1x128xi32>
    %2 = tpu.iota {dimensions = array<i32: 0>} : vector<128x128xi32>
    %3 = vector.broadcast %1 : vector<1x128xi32> to vector<128x128xi32>
    %4 = arith.cmpi eq, %2, %3 : vector<128x128xi32>
    %5 = arith.extui %4 : vector<128x128xi1> to vector<128x128xi32>
    %6 = arith.sitofp %5 : vector<128x128xi32> to vector<128x128xf32>
    %7 = arith.truncf %6 : vector<128x128xf32> to vector<128x128xbf16>
    %c0_2 = arith.constant 0 : index
    %c0_3 = arith.constant 0 : index
    %c0_4 = arith.constant 0 : index
    %8 = vector.load %arg2[%c0_2, %c0_3, %c0_4] : memref<3x32x128xbf16, #tpu.memory_space<vmem>>, vector<1x32x128xbf16>
    %9 = vector.shape_cast %8 : vector<1x32x128xbf16> to vector<32x128xbf16>
    %cst = arith.constant dense<0.000000e+00> : vector<32x128xf32>
    %10 = tpu.matmul %9, %7, %cst {dimension_numbers = #tpu.dot_dimension_numbers<[1], [0], [0], [1], [0, 0, 1, 1], [], []>} : vector<32x128xbf16>, vector<128x128xbf16>, vector<32x128xf32> -> vector<32x128xf32>
    %c1 = arith.constant 1 : index
    %c0_5 = arith.constant 0 : index
    %c0_6 = arith.constant 0 : index
    %11 = vector.load %arg2[%c1, %c0_5, %c0_6] : memref<3x32x128xbf16, #tpu.memory_space<vmem>>, vector<1x32x128xbf16>
    %12 = vector.shape_cast %11 : vector<1x32x128xbf16> to vector<32x128xbf16>
    %cst_7 = arith.constant dense<0.000000e+00> : vector<32x128xf32>
    %13 = tpu.matmul %12, %7, %cst_7 {dimension_numbers = #tpu.dot_dimension_numbers<[1], [0], [0], [1], [0, 0, 1, 1], [], []>} : vector<32x128xbf16>, vector<128x128xbf16>, vector<32x128xf32> -> vector<32x128xf32>
    %14 = arith.addf %10, %13 : vector<32x128xf32>
    %c2 = arith.constant 2 : index
    %c0_8 = arith.constant 0 : index
    %c0_9 = arith.constant 0 : index
    %15 = vector.load %arg2[%c2, %c0_8, %c0_9] : memref<3x32x128xbf16, #tpu.memory_space<vmem>>, vector<1x32x128xbf16>
    %16 = vector.shape_cast %15 : vector<1x32x128xbf16> to vector<32x128xbf16>
    %cst_10 = arith.constant dense<0.000000e+00> : vector<32x128xf32>
    %17 = tpu.matmul %16, %7, %cst_10 {dimension_numbers = #tpu.dot_dimension_numbers<[1], [0], [0], [1], [0, 0, 1, 1], [], []>} : vector<32x128xbf16>, vector<128x128xbf16>, vector<32x128xf32> -> vector<32x128xf32>
    %18 = arith.addf %14, %17 : vector<32x128xf32>
    %c0_11 = arith.constant 0 : index
    %c0_12 = arith.constant 0 : index
    %19 = vector.load %arg3[%c0_11, %c0_12] : memref<32x128xf32, #tpu.memory_space<vmem>>, vector<32x128xf32>
    tpu.vector_store %arg3[%c0_11, %c0_12], %18 {strides = array<i32>} : memref<32x128xf32, #tpu.memory_space<vmem>>, vector<32x128xf32>,
    return
  }
  func.func @transform_0(%arg0: i32) -> (i32, i32, i32) {
    %c0_i32 = arith.constant 0 : i32
    %c0_i32_0 = arith.constant 0 : i32
    %c0_i32_1 = arith.constant 0 : i32
    return %arg0, %c0_i32, %c0_i32_0 : i32, i32, i32
  }
  func.func @transform_1(%arg0: i32) -> (i32, i32, i32) {
    %c0_i32 = arith.constant 0 : i32
    %c0_i32_0 = arith.constant 0 : i32
    %c0_i32_1 = arith.constant 0 : i32
    %c0_i32_2 = arith.constant 0 : i32
    return %c0_i32, %c0_i32_0, %c0_i32_1 : i32, i32, i32
  }
  func.func @transform_2(%arg0: i32) -> (i32, i32) {
    %c0_i32 = arith.constant 0 : i32
    %c0_i32_0 = arith.constant 0 : i32
    return %c0_i32, %arg0 : i32, i32
  }
}

</mosaic_0001>

<bundles_post_ra>
// kernel: tpu_custom_call.1
= control target key start
LH: loop header
LB: loop body
LE: loop exit
PB: predicated region body
PF: predicated region fallthrough
CT: control target
= control target key end

     0   :  { %7 = vsyncpa [#allocation3], 0  ;;  %s855_s0 = inlined_call_operand.hbm [shape: s32[1,1,128], index: 0, kind: input, shape index: {}]   ;;  %s856_s1 = inlined_call_operand.hbm [shape: bf16[3,32,128], index: 1, kind: input, shape index: {}]   ;;  %s857_s2 = inlined_call_operand.hbm [shape: f32[32,128], index: 2, kind: output, shape index: {}]  }
   0x1   :  { %8 = vsyncpa [#allocation6], 0 }
   0x2   :  { %9 = vsyncpa [#allocation4], 0  ;;  %s595_s9 = smov [#allocation2]   ;;  %s596_s11 = smov [#allocation5]  }
   0x3   :  { %s16_s10 = sshll.u32 %s595_s9, 4  ;;  %s25_s12 = sshll.u32 %s596_s11, 4  ;;  %s17_s10 = int_to_ptr.vmem [resolvable:$true] %s16_s10  ;;  %s618_s12 = int_to_ptr.vmem [resolvable:$true] %s25_s12 }
   0x4   :  { %s523_s15 = scalar_lea.hbm %s855_s0, 16 }
   0x5   :  { %p524_p0 = scmp.ne.s32.totalorder %s855_s0, %s523_s15  ;;  %p527_p1 = scmp.lt.u32.totalorder %s523_s15, %s855_s0 }
   0x7   :  { %p529_p2 = pnand %p527_p1, %p524_p0 }
   0x9   :  { %532 = shalt.err (!%p529_p2)
}
   0xa   :  { %s533_s20 = scalar_lea.vmem %s17_s10, 16  ;;  %s537_s21 = scalar_lea.vmem %s17_s10, 32 }
   0xb   :  { %p534_p3 = scmp.ne.s32.totalorder %s17_s10, %s533_s20  ;;  %p538_p4 = scmp.lt.s32.totalorder %s17_s10, %s17_s10 }
   0xc   :  { %p539_p5 = scmp.lt.s32.totalorder %s537_s21, %s533_s20 }
   0xe   :  { %p540_p6 = por %p539_p5, %p538_p4 }
  0x10   :  { %p541_p7 = pnand %p540_p6, %p534_p3 }
  0x12   :  { %544 = shalt.err (!%p541_p7)
}
  0x13   :  { %19 = dma.hbm_to_vmem [thread:$0]  %s855_s0, 16, %s17_s10, [#allocation3]  }
  0x14   :  { %s545_s26 = scalar_lea.hbm %s856_s1, 768 }
  0x15   :  { %p546_p8 = scmp.ne.s32.totalorder %s856_s1, %s545_s26  ;;  %p549_p9 = scmp.lt.u32.totalorder %s545_s26, %s856_s1 }
  0x17   :  { %p551_p10 = pnand %p549_p9, %p546_p8 }
  0x19   :  { %554 = shalt.err (!%p551_p10)
}
  0x1a   :  { %s555_s3 = scalar_lea.vmem %s618_s12, 768  ;;  %p560_p12 = scmp.lt.s32.totalorder %s618_s12, %s618_s12 }
  0x1b   :  { %p556_p11 = scmp.ne.s32.totalorder %s618_s12, %s555_s3  ;;  %p561_p13 = scmp.lt.s32.totalorder %s555_s3, %s555_s3 }
  0x1d   :  { %p562_p0 = por %p561_p13, %p560_p12 }
  0x1f   :  { %p563_p1 = pnand %p562_p0, %p556_p11 }
  0x21   :  { %566 = shalt.err (!%p563_p1)
}
  0x22   :  { %s597_s0 = smov 64   ;;  %s598_s4 = smov 4  }
  0x23   :  { %31 = dma.hbm_to_vmem [thread:$0]  %s856_s1, 768, %s618_s12, [#allocation6], %s597_s0, %s597_s0, %s598_s4  }
  0x24   :  { %589 = dma.done.wait [#allocation3], 16  }
  0x25   :  { %590 = vsyncadd [#allocation3], 4294967280 }
  0x26   :  { %591 = dma.done.wait [#allocation6], 768  }
  0x27   :  { %592 = vsyncadd [#allocation6], 4294966528  ;;  %v40_v0 = vlaneseq  ;;  %v649_v7 = vld [vmem:[#allocation2] ss:$0 sm:$0xff]  ;;  %v517_v8 = vld [vmem:[#allocation5] sm:$0xff]   ;;  %s600_s1 = smov [#allocation7]  }
  0x28   :  { %477 = vmatprep.mubr.bf16.mxu0 %v517_v8  ;;  %v599_v10 = vmov 1.0|1.0   ;;  %v519_v14 = vld [vmem:[#allocation5 + $0x10] sm:$0xff]   ;;  %v518_v29 = vld [vmem:[#allocation5 + $0x8] sm:$0xff]   ;;  %v521_v30 = vld [vmem:[#allocation5 + $0x20] sm:$0xff]   ;;  %s327_s7 = sshll.u32 %s600_s1, 4  ;;  %s328_s7 = int_to_ptr.vmem [resolvable:$true] %s327_s7 }
  0x29   :  { %v41_v1 = vshrl.u32 %v40_v0, 7  ;;  %457 = vmatprep.mubr.bf16.mxu1 %v519_v14  ;;  %v520_v31 = vld [vmem:[#allocation5 + $0x18] sm:$0xff]   ;;  %v522_v32 = vld [vmem:[#allocation5 + $0x28] sm:$0xff]   ;;  %s567_s8 = scalar_lea.vmem %s328_s7, 512  ;;  %p572_p3 = scmp.lt.s32.totalorder %s328_s7, %s328_s7 }
  0x2a   :  { %p568_p2 = scmp.ne.s32.totalorder %s328_s7, %s567_s8  ;;  %p573_p4 = scmp.lt.s32.totalorder %s567_s8, %s567_s8 }
  0x2b   :  { %v42_v2 = vadd.s32 8, %v41_v1  ;;  %v43_v3 = vadd.s32 16, %v41_v1  ;;  %v44_v4 = vadd.s32 24, %v41_v1  ;;  %v45_v5 = vadd.s32 32, %v41_v1 }
  0x2c   :  { %v46_v6 = vadd.s32 40, %v41_v1  ;;  %vm61_vm0 = vcmp.eq.s32.totalorder %v41_v1, %v649_v7  ;;  %v47_v12 = vadd.s32 48, %v41_v1  ;;  %v48_v13 = vadd.s32 56, %v41_v1  ;;  %p574_p5 = por %p573_p4, %p572_p3 }
  0x2d   :  { %vm62_vm1 = vcmp.eq.s32.totalorder %v42_v2, %v649_v7  ;;  %vm63_vm2 = vcmp.eq.s32.totalorder %v43_v3, %v649_v7  ;;  %vm64_vm3 = vcmp.eq.s32.totalorder %v44_v4, %v649_v7  ;;  %vm65_vm6 = vcmp.eq.s32.totalorder %v45_v5, %v649_v7 }
  0x2e   :  { %vm655_vm4 = vmpackc.low %vm62_vm1, %vm61_vm0  ;;  %vm66_vm7 = vcmp.eq.s32.totalorder %v46_v6, %v649_v7  ;;  %vm67_vm9 = vcmp.eq.s32.totalorder %v47_v12, %v649_v7  ;;  %vm68_vm10 = vcmp.eq.s32.totalorder %v48_v13, %v649_v7  ;;  %v49_v16 = vadd.s32 64, %v41_v1  ;;  %p575_p6 = pnand %p574_p5, %p568_p2 }
  0x2f   :  { %461 = vmatprep.subr.msk.bf16.mxu0 %vm655_vm4, %v599_v10  ;;  %vm662_vm5 = vmpackc.low %vm64_vm3, %vm63_vm2  ;;  %441 = vmatprep.subr.msk.bf16.mxu1 %vm655_vm4, %v599_v10  ;;  %v50_v17 = vadd.s32 72, %v41_v1  ;;  %v51_v19 = vadd.s32 80, %v41_v1  ;;  %v52_v20 = vadd.s32 88, %v41_v1  ;;  %v53_v22 = vadd.s32 96, %v41_v1 }
  0x30   :  { %462 = vmatpush3.bf16.msk.msra.mxu0 %vm655_vm4, %v599_v10  ;;  %vm677_vm8 = vmpackc.low %vm66_vm7, %vm65_vm6  ;;  %442 = vmatpush3.bf16.msk.msra.mxu1 %vm655_vm4, %v599_v10  ;;  %vm69_vm12 = vcmp.eq.s32.totalorder %v49_v16, %v649_v7  ;;  %v54_v23 = vadd.s32 104, %v41_v1  ;;  %v55_v25 = vadd.s32 112, %v41_v1  ;;  %v56_v26 = vadd.s32 120, %v41_v1 }
  0x31   :  { %463 = vmatprep.subr.msk.bf16.mxu0 %vm662_vm5, %v599_v10  ;;  %443 = vmatprep.subr.msk.bf16.mxu1 %vm662_vm5, %v599_v10  ;;  %vm695_vm11 = vmpackc.low %vm68_vm10, %vm67_vm9  ;;  %vm70_vm13 = vcmp.eq.s32.totalorder %v50_v17, %v649_v7  ;;  %vm71_vm15 = vcmp.eq.s32.totalorder %v51_v19, %v649_v7  ;;  %vm72_vm0 = vcmp.eq.s32.totalorder %v52_v20, %v649_v7 }
  0x32   :  { %vm713_vm14 = vmpackc.low %vm70_vm13, %vm69_vm12  ;;  %vm73_vm2 = vcmp.eq.s32.totalorder %v53_v22, %v649_v7  ;;  %vm74_vm3 = vcmp.eq.s32.totalorder %v54_v23, %v649_v7  ;;  %vm75_vm7 = vcmp.eq.s32.totalorder %v55_v25, %v649_v7  ;;  %vm76_vm9 = vcmp.eq.s32.totalorder %v56_v26, %v649_v7 }
  0x33   :  { %vm731_vm1 = vmpackc.low %vm72_vm0, %vm71_vm15 }
  0x34   :  { %464 = vmatpush3.bf16.msk.msra.mxu0 %vm662_vm5, %v599_v10  ;;  %444 = vmatpush3.bf16.msk.msra.mxu1 %vm662_vm5, %v599_v10  ;;  %vm749_vm6 = vmpackc.low %vm74_vm3, %vm73_vm2 }
  0x35   :  { %465 = vmatprep.subr.msk.bf16.mxu0 %vm677_vm8, %v599_v10  ;;  %445 = vmatprep.subr.msk.bf16.mxu1 %vm677_vm8, %v599_v10  ;;  %vm767_vm10 = vmpackc.low %vm76_vm9, %vm75_vm7 }
  0x38   :  { %466 = vmatpush3.bf16.msk.msra.mxu0 %vm677_vm8, %v599_v10  ;;  %446 = vmatpush3.bf16.msk.msra.mxu1 %vm677_vm8, %v599_v10 }
  0x39   :  { %467 = vmatprep.subr.msk.bf16.mxu0 %vm695_vm11, %v599_v10  ;;  %447 = vmatprep.subr.msk.bf16.mxu1 %vm695_vm11, %v599_v10 }
  0x3c   :  { %468 = vmatpush3.bf16.msk.msra.mxu0 %vm695_vm11, %v599_v10  ;;  %448 = vmatpush3.bf16.msk.msra.mxu1 %vm695_vm11, %v599_v10 }
  0x3d   :  { %469 = vmatprep.subr.msk.bf16.mxu0 %vm713_vm14, %v599_v10  ;;  %449 = vmatprep.subr.msk.bf16.mxu1 %vm713_vm14, %v599_v10 }
  0x40   :  { %470 = vmatpush3.bf16.msk.msra.mxu0 %vm713_vm14, %v599_v10  ;;  %450 = vmatpush3.bf16.msk.msra.mxu1 %vm713_vm14, %v599_v10 }
  0x41   :  { %471 = vmatprep.subr.msk.bf16.mxu0 %vm731_vm1, %v599_v10  ;;  %451 = vmatprep.subr.msk.bf16.mxu1 %vm731_vm1, %v599_v10 }
  0x44   :  { %472 = vmatpush3.bf16.msk.msra.mxu0 %vm731_vm1, %v599_v10  ;;  %452 = vmatpush3.bf16.msk.msra.mxu1 %vm731_vm1, %v599_v10 }
  0x45   :  { %473 = vmatprep.subr.msk.bf16.mxu0 %vm749_vm6, %v599_v10  ;;  %453 = vmatprep.subr.msk.bf16.mxu1 %vm749_vm6, %v599_v10 }
  0x48   :  { %474 = vmatpush3.bf16.msk.msra.mxu0 %vm749_vm6, %v599_v10  ;;  %454 = vmatpush3.bf16.msk.msra.mxu1 %vm749_vm6, %v599_v10 }
  0x49   :  { %475 = vmatprep.subr.msk.bf16.mxu0 %vm767_vm10, %v599_v10  ;;  %455 = vmatprep.subr.msk.bf16.mxu1 %vm767_vm10, %v599_v10 }
  0x4c   :  { %476 = vmatpush3.bf16.msk.msra.mxu0 %vm767_vm10, %v599_v10  ;;  %456 = vmatpush3.bf16.msk.msra.mxu1 %vm767_vm10, %v599_v10 }
  0x4d   :  { %481 = vmatprep.subr.msk.bf16.mxu0 %vm655_vm4, %v599_v10 }
  0x4f   :  { %478 = vmatmul.mubr.bf16.vlgmr.msra.gmra.mrb[0].mxu0 %v518_v29  ;;  %458 = vmatmul.mubr.bf16.vlgmr.msra.gmra.mrb[0].mxu1 %v520_v31 }
  0x50   :  { %482 = vmatpush3.bf16.msk.msra.mxu0 %vm655_vm4, %v599_v10  ;;  %497 = vmatprep.mubr.bf16.mxu0 %v521_v30 }
  0x51   :  { %483 = vmatprep.subr.msk.bf16.mxu0 %vm662_vm5, %v599_v10 }
  0x54   :  { %484 = vmatpush3.bf16.msk.msra.mxu0 %vm662_vm5, %v599_v10 }
  0x55   :  { %485 = vmatprep.subr.msk.bf16.mxu0 %vm677_vm8, %v599_v10 }
  0x58   :  { %486 = vmatpush3.bf16.msk.msra.mxu0 %vm677_vm8, %v599_v10 }
  0x59   :  { %487 = vmatprep.subr.msk.bf16.mxu0 %vm695_vm11, %v599_v10 }
  0x5c   :  { %488 = vmatpush3.bf16.msk.msra.mxu0 %vm695_vm11, %v599_v10 }
  0x5d   :  { %489 = vmatprep.subr.msk.bf16.mxu0 %vm713_vm14, %v599_v10 }
  0x60   :  { %490 = vmatpush3.bf16.msk.msra.mxu0 %vm713_vm14, %v599_v10 }
  0x61   :  { %491 = vmatprep.subr.msk.bf16.mxu0 %vm731_vm1, %v599_v10 }
  0x64   :  { %492 = vmatpush3.bf16.msk.msra.mxu0 %vm731_vm1, %v599_v10 }
  0x65   :  { %493 = vmatprep.subr.msk.bf16.mxu0 %vm749_vm6, %v599_v10 }
  0x68   :  { %494 = vmatpush3.bf16.msk.msra.mxu0 %vm749_vm6, %v599_v10 }
  0x69   :  { %495 = vmatprep.subr.msk.bf16.mxu0 %vm767_vm10, %v599_v10 }
  0x6c   :  { %496 = vmatpush3.bf16.msk.msra.mxu0 %vm767_vm10, %v599_v10 }
  0x6f   :  { %498 = vmatmul.mubr.bf16.vlgmr.msra.gmra.mrb[0].mxu0 %v522_v32 }
 0x122   :  { %v459_v33 = vpop.f32.mrb[0].mxu1 }
 0x123   :  { %v172_v34 = vpop.f32.mrb[1].mxu1 }
 0x124   :  { %v460_v35 = vpop.f32.mrb[2].mxu1 }
 0x125   :  { %v175_v36 = vpop.f32.mrb[3].mxu1 }
 0x142   :  { %v499_v37 = vpop.f32.mrb[0].mxu0 }
 0x143   :  { %v501_v38 = vadd.f32 %v499_v37, %v459_v33  ;;  %v299_v39 = vpop.f32.mrb[1].mxu0 }
 0x144   :  { %v502_v40 = vadd.f32 %v299_v39, %v172_v34  ;;  %v500_v41 = vpop.f32.mrb[2].mxu0 }
 0x145   :  { %320 = vst [vmem:[#allocation7 + $0x10] sm:$0xff] %v501_v38  ;;  %v503_v42 = vadd.f32 %v500_v41, %v460_v35  ;;  %v302_v43 = vpop.f32.mrb[3].mxu0 }
 0x146   :  { %318 = vst [vmem:[#allocation7] sm:$0xff] %v502_v40  ;;  %v504_v44 = vadd.f32 %v302_v43, %v175_v36 }
 0x147   :  { %321 = vst [vmem:[#allocation7 + $0x18] sm:$0xff] %v503_v42 }
 0x148   :  { %319 = vst [vmem:[#allocation7 + $0x8] sm:$0xff] %v504_v44 }
 0x149   :  { %578 = shalt.err (!%p575_p6)
}
 0x14a   :  { %s579_s11 = scalar_lea.hbm %s857_s2, 512 }
 0x14b   :  { %p580_p7 = scmp.ne.s32.totalorder %s857_s2, %s579_s11  ;;  %p583_p8 = scmp.lt.u32.totalorder %s579_s11, %s857_s2 }
 0x14d   :  { %p585_p9 = pnand %p583_p8, %p580_p7 }
 0x14f   :  { %588 = shalt.err (!%p585_p9)
}
 0x150   :  { %s601_s16 = smov 128   ;;  %s602_s17 = smov 8  }
 0x151   :  { %333 = dma.vmem_to_hbm [thread:$0]  %s328_s7, 512, %s857_s2, [#allocation4], %s601_s16, %s601_s16, %s602_s17  }
 0x152   :  { %593 = dma.done.wait [#allocation4], 512  }
 0x153   :  { %594 = vsyncadd [#allocation4], 4294966784 }
 0x154   :  { %337 = vsyncpa [#allocation3], 1 }
 0x155   :  { %338 = vsyncpa [#allocation6], 1 }
 0x156   :  { %339 = vsyncpa [#allocation4], 1 }

</bundles_post_ra>
